<compile_context>
chip_gen: v7x
topology: tpu7x:2x2x1
jax: 0.10.0
libtpu: 0.0.40
codegen_flags: <defaults>
</compile_context>

<pallas_src>
import functools

import jax
import jax.numpy as jnp
from jax.experimental import pallas as pl
from jax.experimental.pallas import tpu as pltpu


def _round_up(x, m):
    return ((x + m - 1) // m) * m


# Approximate fraction of HBM roofline achieved per f32 tile size (measured v6e).
_TILE_EFF = {512: 0.85, 384: 0.78, 256: 0.63, 128: 0.29}


def _pick_tile(n, max_tile):
    """Pick the tile maximizing (per-tile efficiency) / (ragged-edge waste)."""
    max_tile = max(int(max_tile), 128)
    best_t, best_score = 128, -1.0
    for t, eff in _TILE_EFF.items():
        if t > max_tile or t > n:
            continue
        waste = (pl.cdiv(n, t) * t) / float(n)
        score = eff / waste
        if score > best_score:
            best_t, best_score = t, score
    return best_t


# ----------------------------------------------------------------------------
# Fused path (moderate N): everything in one VMEM-resident kernel.
# ----------------------------------------------------------------------------
def _fused_kernel(a_ref, out_ref, *, symmetric):
    a = a_ref[...]                       # (Np, Np), Np multiple of 128
    at = a.T                             # aligned square transpose (XLU)
    if symmetric:
        m = a + at
        d_i = jnp.sum(m, axis=1, keepdims=True)     # (Np, 1) rowsum
        d_j = jnp.sum(m, axis=0, keepdims=True)     # (1, Np) == rowsum (m symmetric)
    else:
        m = a
        d_i = jnp.sum(a, axis=1, keepdims=True)     # (Np, 1) rowsum(A)
        d_j = jnp.sum(at, axis=0, keepdims=True)    # (1, Np) rowsum(A) laid out as a row
    d_i = d_i + 1.0                                  # +I folded into the degree
    d_j = d_j + 1.0
    # rsqrt on the EUP; d == 0 -> inf -> 0 (matches torch), d < 0 -> NaN kept.
    r_i = jnp.where(d_i == 0.0, 0.0, jax.lax.rsqrt(d_i))   # (Np, 1)
    r_j = jnp.where(d_j == 0.0, 0.0, jax.lax.rsqrt(d_j))   # (1, Np)
    out = (r_i * m) * r_j
    ri = jax.lax.broadcasted_iota(jnp.int32, (m.shape[0], 1), 0)
    ci = jax.lax.broadcasted_iota(jnp.int32, (1, m.shape[1]), 1)
    out_ref[...] = out + jnp.where(ri == ci, r_i * r_j, 0.0)


def _normalize_fused(a, symmetric):
    n = a.shape[0]
    n_pad = max(_round_up(n, 128), 128)
    if n_pad != n:
        # Small path only: pad cost is negligible and keeps every in-kernel
        # shape (8,128)-aligned (zero rows/cols never leak into valid output).
        a = jnp.pad(a, ((0, n_pad - n), (0, n_pad - n)))
    out = pl.pallas_call(
        functools.partial(_fused_kernel, symmetric=symmetric),
        out_shape=jax.ShapeDtypeStruct((n_pad, n_pad), jnp.float32),
        compiler_params=pltpu.CompilerParams(vmem_limit_bytes=32 * 1024 * 1024),
        cost_estimate=pl.CostEstimate(
            flops=(4 if symmetric else 3) * n_pad * n_pad,
            transcendentals=2 * n_pad,
            bytes_accessed=8 * n_pad * n_pad),
    )(a)
    if n_pad != n:
        out = out[:n, :n]
    return out


# ----------------------------------------------------------------------------
# Tiled pass 1 (large N): rowsum(A) as (N,1) column; in symmetric mode also
# colsum(A) (= rowsum(A^T)) as a (1,N) row -- no (T,T) tile transposes.
# ----------------------------------------------------------------------------
def _rowsum_kernel(a_ref, rs_ref, *, n, tile, ragged):
    j = pl.program_id(1)

    @pl.when(j == 0)
    def _():
        rs_ref[...] = jnp.zeros_like(rs_ref)

    a = a_ref[...]
    if ragged:
        col = jax.lax.broadcasted_iota(jnp.int32, (1, a.shape[1]), 1)
        a = jnp.where(j * tile + col < n, a, 0.0)
    rs_ref[...] += jnp.sum(a, axis=1, keepdims=True)


def _rowsum_sym_kernel(a_ref, at_ref, rs_ref, cs_ref, *, n, tile, ragged):
    j = pl.program_id(1)

    @pl.when(j == 0)
    def _():
        rs_ref[...] = jnp.zeros_like(rs_ref)
        cs_ref[...] = jnp.zeros_like(cs_ref)

    a = a_ref[...]                # A block (i, j)
    at = at_ref[...]              # A block (j, i)
    if ragged:
        col = jax.lax.broadcasted_iota(jnp.int32, (1, a.shape[1]), 1)
        a = jnp.where(j * tile + col < n, a, 0.0)
        row = jax.lax.broadcasted_iota(jnp.int32, (at.shape[0], 1), 0)
        at = jnp.where(j * tile + row < n, at, 0.0)
    rs_ref[...] += jnp.sum(a, axis=1, keepdims=True)    # rowsum(A), (T,1)
    cs_ref[...] += jnp.sum(at, axis=0, keepdims=True)   # colsum(A) = rowsum(A^T), (1,T)


def _rowsum_pallas(a, n, tile, symmetric):
    g = pl.cdiv(n, tile)
    ragged = (n % tile) != 0
    a_spec = pl.BlockSpec((tile, tile), lambda i, j: (i, j))
    at_spec = pl.BlockSpec((tile, tile), lambda i, j: (j, i))
    rs_spec = pl.BlockSpec((tile, 1), lambda i, j: (i, 0))
    cs_spec = pl.BlockSpec((1, tile), lambda i, j: (0, i))
    cost = pl.CostEstimate(
        flops=(2 if symmetric else 1) * n * n,
        transcendentals=0,
        bytes_accessed=(2 if symmetric else 1) * 4 * n * n + 8 * n)
    if symmetric:
        return pl.pallas_call(
            functools.partial(_rowsum_sym_kernel, n=n, tile=tile, ragged=ragged),
            out_shape=(jax.ShapeDtypeStruct((n, 1), jnp.float32),
                       jax.ShapeDtypeStruct((1, n), jnp.float32)),
            grid=(g, g),
            in_specs=[a_spec, at_spec],
            out_specs=(rs_spec, cs_spec),
            compiler_params=pltpu.CompilerParams(
                dimension_semantics=("parallel", "arbitrary")),
            cost_estimate=cost,
        )(a, a)
    return pl.pallas_call(
        functools.partial(_rowsum_kernel, n=n, tile=tile, ragged=ragged),
        out_shape=jax.ShapeDtypeStruct((n, 1), jnp.float32),
        grid=(g, g),
        in_specs=[a_spec],
        out_specs=rs_spec,
        compiler_params=pltpu.CompilerParams(
            dimension_semantics=("parallel", "arbitrary")),
        cost_estimate=cost,
    )(a)


# ----------------------------------------------------------------------------
# Tiled pass 2: out[i,j] = r[i] * (A (+A^T))[i,j] * r[j] plus the folded
# identity term r[i]*r[j] on the diagonal (diagonal tiles only).
# ----------------------------------------------------------------------------
def _scale_body(m, r_row_ref, r_col_ref, out_ref):
    r_i = r_row_ref[...]          # (T, 1)
    r_j = r_col_ref[...]          # (1, T)
    out = (r_i * m) * r_j

    i = pl.program_id(0)
    j = pl.program_id(1)

    @pl.when(i == j)              # diagonal tile: add D^{-1/2} I D^{-1/2}
    def _():
        ri = jax.lax.broadcasted_iota(jnp.int32, (m.shape[0], 1), 0)
        ci = jax.lax.broadcasted_iota(jnp.int32, (1, m.shape[1]), 1)
        out_ref[...] = out + jnp.where(ri == ci, r_i * r_j, 0.0)

    @pl.when(i != j)
    def _():
        out_ref[...] = out


def _scale_kernel(a_ref, r_row_ref, r_col_ref, out_ref):
    _scale_body(a_ref[...], r_row_ref, r_col_ref, out_ref)


def _scale_sym_kernel(a_ref, at_ref, r_row_ref, r_col_ref, out_ref):
    # The (T,T) tile transpose hides under DMA on v5e/v6e.  On v7x it could be
    # replaced by mirroring the upper-triangular result (output symmetry) or an
    # MXU-routed transpose; kept simple here for robustness.
    _scale_body(a_ref[...] + at_ref[...].T, r_row_ref, r_col_ref, out_ref)


def _scale_pallas(a, r_row, r_col, n, tile, symmetric):
    g = pl.cdiv(n, tile)
    a_spec = pl.BlockSpec((tile, tile), lambda i, j: (i, j))
    at_spec = pl.BlockSpec((tile, tile), lambda i, j: (j, i))
    rrow_spec = pl.BlockSpec((tile, 1), lambda i, j: (i, 0))
    rcol_spec = pl.BlockSpec((1, tile), lambda i, j: (0, j))
    out_spec = pl.BlockSpec((tile, tile), lambda i, j: (i, j))
    cost = pl.CostEstimate(
        flops=3 * n * n,
        transcendentals=0,
        bytes_accessed=((2 if symmetric else 1) + 1) * 4 * n * n + 8 * n)
    if symmetric:
        kernel = _scale_sym_kernel
        in_specs = [a_spec, at_spec, rrow_spec, rcol_spec]
        operands = (a, a, r_row, r_col)
    else:
        kernel = _scale_kernel
        in_specs = [a_spec, rrow_spec, rcol_spec]
        operands = (a, r_row, r_col)
    return pl.pallas_call(
        kernel,
        out_shape=jax.ShapeDtypeStruct((n, n), jnp.float32),
        grid=(g, g),
        in_specs=in_specs,
        out_specs=out_spec,
        compiler_params=pltpu.CompilerParams(
            dimension_semantics=("parallel", "parallel"),
            vmem_limit_bytes=48 * 1024 * 1024),
        cost_estimate=cost,
    )(*operands)


# ----------------------------------------------------------------------------
# normalize(): fused path for moderate N, pad-free two-pass tiled path otherwise.
# ----------------------------------------------------------------------------
@functools.partial(jax.jit,
                   static_argnames=("symmetric", "fused_threshold", "max_tile"))
def normalize_pallas(estimated_adj, symmetric=False, fused_threshold=768,
                     max_tile=512):
    a = estimated_adj.astype(jnp.float32)
    n = a.shape[0]

    if n <= fused_threshold or n < 128:
        return _normalize_fused(a, symmetric)

    tile = _pick_tile(n, max_tile)

    # Pass 1 (Pallas): degree sums.
    if symmetric:
        rs_col, cs_row = _rowsum_pallas(a, n, tile, symmetric=True)
        d = rs_col + jnp.reshape(cs_row, (n, 1))
    else:
        d = _rowsum_pallas(a, n, tile, symmetric=False)

    # O(N) XLA glue: +I fold, rsqrt, inf -> 0 (NaN from negative sums kept,
    # matching the PyTorch reference), plus the (1,N) relayout of r.
    d = d + 1.0
    r = d ** -0.5
    r = jnp.where(jnp.isinf(r), 0.0, r)
    r_row = r                               # (N, 1)
    r_col = jnp.reshape(r, (1, n))          # (1, N)

    # Pass 2 (Pallas): tiled scaling + diagonal identity fold.
    return _scale_pallas(a, r_row, r_col, n, tile, symmetric)


# ----------------------------------------------------------------------------
# Module-like wrapper mirroring the PyTorch class.
# ----------------------------------------------------------------------------
class EstimateAdj:
    def __init__(self, adj, symmetric=False):
        # _init_estimation: parameter is a straight copy of `adj`.
        self.estimated_adj = jnp.asarray(adj, dtype=jnp.float32)
        self.symmetric = symmetric

    def forward(self):
        # PyTorch forward() just returns the parameter; no copy kernel needed.
        return self.estimated_adj

    def normalize(self):
        return normalize_pallas(self.estimated_adj, symmetric=self.symmetric)


# ----------------------------------------------------------------------------
# Pure-JAX reference (sanity check inside this script).
# ----------------------------------------------------------------------------
def _normalize_ref(adj, symmetric):
    a = adj + adj.T if symmetric else adj
    mx = a + jnp.eye(a.shape[0], dtype=a.dtype)
    rowsum = mx.sum(axis=1)
    r_inv = rowsum ** (-0.5)
    r_inv = jnp.where(jnp.isinf(r_inv), 0.0, r_inv)
    r_mat = jnp.diag(r_inv)
    return r_mat @ mx @ r_mat


if __name__ == "__main__":
    def _rand_adj(k, n, thresh):
        a = (jax.random.uniform(k, (n, n)) > thresh).astype(jnp.float32)
        return a * (1.0 - jnp.eye(n, dtype=jnp.float32))

    key = jax.random.PRNGKey(0)

    # ---- small graph (16 x 16): module API + fused path ----
    n = 16
    adj = _rand_adj(key, n, 0.7)

    model = EstimateAdj(adj, symmetric=False)
    out_fwd = jax.block_until_ready(model.forward())
    assert out_fwd.shape == (n, n)
    assert jnp.allclose(out_fwd, adj)

    out_norm = jax.block_until_ready(model.normalize())
    assert jnp.allclose(out_norm, _normalize_ref(adj, False), atol=1e-5, rtol=1e-5)

    model_sym = EstimateAdj(adj, symmetric=True)
    out_sym = jax.block_until_ready(model_sym.normalize())
    assert jnp.allclose(out_sym, _normalize_ref(adj, True), atol=1e-5, rtol=1e-5)

    # ---- 200 x 200 (non-128-multiple): fused path (default) and forced
    #      tiled path (2x2 ragged grid exercises pad-free edge masking,
    #      the dual-accumulator symmetric rowsum, and diagonal gating) ----
    n2 = 200
    adj2 = _rand_adj(jax.random.PRNGKey(0), n2, 0.8)
    ref2 = _normalize_ref(adj2, False)
    ref2s = _normalize_ref(adj2, True)

    out2 = jax.block_until_ready(normalize_pallas(adj2, symmetric=False))
    assert jnp.allclose(out2, ref2, atol=1e-5, rtol=1e-5)
    out2s = jax.block_until_ready(normalize_pallas(adj2, symmetric=True))
    assert jnp.allclose(out2s, ref2s, atol=1e-5, rtol=1e-5)

    out2t = jax.block_until_ready(
        normalize_pallas(adj2, symmetric=False, fused_threshold=0, max_tile=128))
    assert jnp.allclose(out2t, ref2, atol=1e-5, rtol=1e-5)
    out2ts = jax.block_until_ready(
        normalize_pallas(adj2, symmetric=True, fused_threshold=0, max_tile=128))
    assert jnp.allclose(out2ts, ref2s, atol=1e-5, rtol=1e-5)

    # ---- 256 x 256: tile-aligned tiled path (no in-kernel masking branch) ----
    n3 = 256
    adj3 = _rand_adj(jax.random.PRNGKey(0), n3, 0.9)
    out3 = jax.block_until_ready(
        normalize_pallas(adj3, symmetric=True, fused_threshold=0, max_tile=128))
    assert jnp.allclose(out3, _normalize_ref(adj3, True), atol=1e-5, rtol=1e-5)
    out3n = jax.block_until_ready(
        normalize_pallas(adj3, symmetric=False, fused_threshold=0, max_tile=128))
    assert jnp.allclose(out3n, _normalize_ref(adj3, False), atol=1e-5, rtol=1e-5)

    print("KERNEL_OK")
</pallas_src>

<mosaic_0001>
module attributes {stable_mosaic.version = 11 : i64} {
  func.func @_fused_kernel(%arg0: memref<128x128xf32, #tpu.memory_space<vmem>>, %arg1: memref<128x128xf32, #tpu.memory_space<vmem>>) attributes {dimension_semantics = [], scalar_prefetch = 0 : i64, scratch_operands = 0 : i64, tpu.core_type = #tpu.core_type<tc>} {
    %c0 = arith.constant 0 : index
    %c0_0 = arith.constant 0 : index
    %0 = vector.load %arg0[%c0, %c0_0] : memref<128x128xf32, #tpu.memory_space<vmem>>, vector<128x128xf32>
    %1 = tpu.transpose %0, [1, 0] : vector<128x128xf32> -> vector<128x128xf32>
    %cst = arith.constant dense<0.000000e+00> : vector<128xf32>
    %2 = vector.multi_reduction <add>, %0, %cst [1] : vector<128x128xf32> to vector<128xf32>
    %3 = vector.shape_cast %2 : vector<128xf32> to vector<128x1xf32>
    %cst_1 = arith.constant dense<0.000000e+00> : vector<128xf32>
    %4 = vector.multi_reduction <add>, %1, %cst_1 [0] : vector<128x128xf32> to vector<128xf32>
    %5 = vector.shape_cast %4 : vector<128xf32> to vector<1x128xf32>
    %cst_2 = arith.constant 1.000000e+00 : f32
    %6 = vector.broadcast %cst_2 : f32 to vector<128x1xf32>
    %7 = arith.addf %3, %6 : vector<128x1xf32>
    %cst_3 = arith.constant 1.000000e+00 : f32
    %8 = vector.broadcast %cst_3 : f32 to vector<1x128xf32>
    %9 = arith.addf %5, %8 : vector<1x128xf32>
    %cst_4 = arith.constant 0.000000e+00 : f32
    %10 = vector.broadcast %cst_4 : f32 to vector<128x1xf32>
    %11 = arith.cmpf oeq, %7, %10 : vector<128x1xf32>
    %12 = math.rsqrt %7 : vector<128x1xf32>
    %cst_5 = arith.constant 0.000000e+00 : f32
    %13 = vector.broadcast %cst_5 : f32 to vector<128x1xf32>
    %14 = arith.select %11, %13, %12 : vector<128x1xi1>, vector<128x1xf32>
    %cst_6 = arith.constant 0.000000e+00 : f32
    %15 = vector.broadcast %cst_6 : f32 to vector<1x128xf32>
    %16 = arith.cmpf oeq, %9, %15 : vector<1x128xf32>
    %17 = math.rsqrt %9 : vector<1x128xf32>
    %cst_7 = arith.constant 0.000000e+00 : f32
    %18 = vector.broadcast %cst_7 : f32 to vector<1x128xf32>
    %19 = arith.select %16, %18, %17 : vector<1x128xi1>, vector<1x128xf32>
    %20 = vector.broadcast %14 : vector<128x1xf32> to vector<128x128xf32>
    %21 = arith.mulf %20, %0 : vector<128x128xf32>
    %22 = vector.broadcast %19 : vector<1x128xf32> to vector<128x128xf32>
    %23 = arith.mulf %21, %22 : vector<128x128xf32>
    %24 = tpu.iota {dimensions = array<i32: 0>} : vector<128x1xi32>
    %25 = tpu.iota {dimensions = array<i32: 1>} : vector<1x128xi32>
    %26 = vector.broadcast %24 : vector<128x1xi32> to vector<128x128xi32>
    %27 = vector.broadcast %25 : vector<1x128xi32> to vector<128x128xi32>
    %28 = arith.cmpi eq, %26, %27 : vector<128x128xi32>
    %29 = vector.broadcast %14 : vector<128x1xf32> to vector<128x128xf32>
    %30 = vector.broadcast %19 : vector<1x128xf32> to vector<128x128xf32>
    %31 = arith.mulf %29, %30 : vector<128x128xf32>
    %cst_8 = arith.constant 0.000000e+00 : f32
    %32 = vector.broadcast %cst_8 : f32 to vector<128x128xf32>
    %33 = arith.select %28, %31, %32 : vector<128x128xi1>, vector<128x128xf32>
    %34 = arith.addf %23, %33 : vector<128x128xf32>
    %c0_9 = arith.constant 0 : index
    %c0_10 = arith.constant 0 : index
    %35 = vector.load %arg1[%c0_9, %c0_10] : memref<128x128xf32, #tpu.memory_space<vmem>>, vector<128x128xf32>
    tpu.vector_store %arg1[%c0_9, %c0_10], %34 {strides = array<i32>} : memref<128x128xf32, #tpu.memory_space<vmem>>, vector<128x128xf32>,
    return
  }
}

</mosaic_0001>

<bundles_post_ra>
// kernel: normalize_pallas.1
= control target key start
LH: loop header
LB: loop body
LE: loop exit
PB: predicated region body
PF: predicated region fallthrough
CT: control target
= control target key end

     0   :  { %s830_s0 = inlined_call_operand.vmem [shape: f32[128,128], index: 0, kind: input, shape index: {}]   ;;  %s831_s1 = inlined_call_operand.vmem [shape: f32[128,128], index: 1, kind: output, shape index: {}]  }
   0x1   :  { %v359_v0 = vld [vmem:[%s830_s0] sm:$0xff]  ;;  %v366_v1 = vld [vmem:[%s830_s0 + $0x8] sm:$0xff]  ;;  %v373_v2 = vld [vmem:[%s830_s0 + $0x10] sm:$0xff] }
   0x2   :  { %56 = vadd.xlane.f32.xlu1 %v359_v0  ;;  %24 = vxpose.xlu0.b32.start [1/16] %v359_v0, 128  ;;  %v380_v3 = vld [vmem:[%s830_s0 + $0x18] sm:$0xff]  ;;  %v387_v4 = vld [vmem:[%s830_s0 + $0x20] sm:$0xff]  ;;  %v394_v5 = vld [vmem:[%s830_s0 + $0x28] sm:$0xff] }
   0x3   :  { %v401_v6 = vld [vmem:[%s830_s0 + $0x30] sm:$0xff]  ;;  %v408_v7 = vld [vmem:[%s830_s0 + $0x38] sm:$0xff]  ;;  %v415_v8 = vld [vmem:[%s830_s0 + $0x40] sm:$0xff] }
   0x4   :  { %v422_v9 = vld [vmem:[%s830_s0 + $0x48] sm:$0xff]  ;;  %v429_v10 = vld [vmem:[%s830_s0 + $0x50] sm:$0xff]  ;;  %v436_v11 = vld [vmem:[%s830_s0 + $0x58] sm:$0xff] }
   0x5   :  { %v443_v12 = vld [vmem:[%s830_s0 + $0x60] sm:$0xff]  ;;  %v450_v13 = vld [vmem:[%s830_s0 + $0x68] sm:$0xff]  ;;  %v457_v14 = vld [vmem:[%s830_s0 + $0x70] sm:$0xff] }
   0x6   :  { %58 = vadd.xlane.f32.xlu1 %v366_v1  ;;  %25 = vxpose.xlu0.b32.cont [2/16] %v366_v1, 128  ;;  %v464_v15 = vld [vmem:[%s830_s0 + $0x78] sm:$0xff] }
   0xa   :  { %60 = vadd.xlane.f32.xlu1 %v373_v2  ;;  %26 = vxpose.xlu0.b32.cont [3/16] %v373_v2, 128 }
   0xe   :  { %62 = vadd.xlane.f32.xlu1 %v380_v3  ;;  %27 = vxpose.xlu0.b32.cont [4/16] %v380_v3, 128 }
  0x12   :  { %64 = vadd.xlane.f32.xlu1 %v387_v4  ;;  %28 = vxpose.xlu0.b32.cont [5/16] %v387_v4, 128 }
  0x16   :  { %66 = vadd.xlane.f32.xlu1 %v394_v5  ;;  %29 = vxpose.xlu0.b32.cont [6/16] %v394_v5, 128 }
  0x1a   :  { %68 = vadd.xlane.f32.xlu1 %v401_v6  ;;  %30 = vxpose.xlu0.b32.cont [7/16] %v401_v6, 128 }
  0x1e   :  { %70 = vadd.xlane.f32.xlu1 %v408_v7  ;;  %31 = vxpose.xlu0.b32.cont [8/16] %v408_v7, 128 }
  0x22   :  { %72 = vadd.xlane.f32.xlu1 %v415_v8  ;;  %32 = vxpose.xlu0.b32.cont [9/16] %v415_v8, 128 }
  0x26   :  { %74 = vadd.xlane.f32.xlu1 %v422_v9  ;;  %33 = vxpose.xlu0.b32.cont [10/16] %v422_v9, 128 }
  0x2a   :  { %76 = vadd.xlane.f32.xlu1 %v429_v10  ;;  %34 = vxpose.xlu0.b32.cont [11/16] %v429_v10, 128 }
  0x2e   :  { %78 = vadd.xlane.f32.xlu1 %v436_v11  ;;  %35 = vxpose.xlu0.b32.cont [12/16] %v436_v11, 128 }
  0x32   :  { %80 = vadd.xlane.f32.xlu1 %v443_v12  ;;  %36 = vxpose.xlu0.b32.cont [13/16] %v443_v12, 128 }
  0x36   :  { %82 = vadd.xlane.f32.xlu1 %v450_v13  ;;  %37 = vxpose.xlu0.b32.cont [14/16] %v450_v13, 128 }
  0x3a   :  { %84 = vadd.xlane.f32.xlu1 %v457_v14  ;;  %38 = vxpose.xlu0.b32.cont [15/16] %v457_v14, 128 }
  0x3e   :  { %86 = vadd.xlane.f32.xlu1 %v464_v15  ;;  %39 = vxpose.xlu0.b32.end [16/16] %v464_v15, 128 }
  0x82   :  { %v40_v16 = vpop.trf.xlu0 }
  0x86   :  { %v41_v17 = vpop.trf.xlu0 }
  0x87   :  { %v88_v30 = vadd.f32 %v41_v17, %v40_v16 }
  0x8a   :  { %v42_v18 = vpop.trf.xlu0 }
  0x8b   :  { %v89_v32 = vadd.f32 %v88_v30, %v42_v18 }
  0x8e   :  { %v43_v19 = vpop.trf.xlu0 }
  0x8f   :  { %v57_v20 = vpop.xlane.xlu1 %56  ;;  %v90_v34 = vadd.f32 %v89_v32, %v43_v19 }
  0x90   :  { %v468_v52 = vadd.f32 1.0, %v57_v20 }
  0x92   :  { %v44_v21 = vpop.trf.xlu0  ;;  %312 = vrsqrt.f32 %v468_v52  ;;  %vm126_vm0 = vcmp.eq.f32.partialorder %v468_v52, 0.0 }
  0x93   :  { %v59_v22 = vpop.xlane.xlu1 %58  ;;  %v91_v36 = vadd.f32 %v90_v34, %v44_v21  ;;  %v209_v21 = vlaneseq }
  0x94   :  { %v470_v53 = vadd.f32 1.0, %v59_v22 }
  0x96   :  { %v45_v23 = vpop.trf.xlu0  ;;  %314 = vrsqrt.f32 %v470_v53  ;;  %vm127_vm1 = vcmp.eq.f32.partialorder %v470_v53, 0.0 }
  0x97   :  { %v61_v24 = vpop.xlane.xlu1 %60  ;;  %v92_v38 = vadd.f32 %v91_v36, %v45_v23 }
  0x98   :  { %v472_v55 = vadd.f32 1.0, %v61_v24 }
  0x9a   :  { %v46_v25 = vpop.trf.xlu0  ;;  %316 = vrsqrt.f32 %v472_v55  ;;  %vm128_vm2 = vcmp.eq.f32.partialorder %v472_v55, 0.0 }
  0x9b   :  { %v63_v26 = vpop.xlane.xlu1 %62  ;;  %v93_v40 = vadd.f32 %v92_v38, %v46_v25 }
  0x9c   :  { %v474_v57 = vadd.f32 1.0, %v63_v26  ;;  %v313_v32 = vpop.eup %312 }
  0x9e   :  { %v47_v27 = vpop.trf.xlu0  ;;  %318 = vrsqrt.f32 %v474_v57  ;;  %vm129_vm3 = vcmp.eq.f32.partialorder %v474_v57, 0.0 }
  0x9f   :  { %v65_v28 = vpop.xlane.xlu1 %64  ;;  %v94_v42 = vadd.f32 %v93_v40, %v47_v27 }
  0xa0   :  { %v477_v60 = vadd.f32 1.0, %v65_v28  ;;  %v502_v28 = vshrl.u32 %v209_v21, 7 }
  0xa2   :  { %v48_v29 = vpop.trf.xlu0  ;;  %320 = vrsqrt.f32 %v477_v60  ;;  %v515_v38 = vadd.s32 16, %v502_v28  ;;  %vm130_vm4 = vcmp.eq.f32.partialorder %v477_v60, 0.0  ;;  %v580_v60 = vadd.s32 104, %v502_v28 }
  0xa3   :  { %v67_v31 = vpop.xlane.xlu1 %66  ;;  %v95_v44 = vadd.f32 %v94_v42, %v48_v29  ;;  %v521_v42 = vadd.s32 24, %v502_v28 }
  0xa4   :  { %v480_v61 = vadd.f32 1.0, %v67_v31 }
  0xa6   :  { %v49_v33 = vpop.trf.xlu0  ;;  %322 = vrsqrt.f32 %v480_v61  ;;  %vm131_vm5 = vcmp.eq.f32.partialorder %v480_v61, 0.0 }
  0xa7   :  { %v69_v35 = vpop.xlane.xlu1 %68  ;;  %v96_v46 = vadd.f32 %v95_v44, %v49_v33  ;;  %v315_v33 = vpop.eup %314 }
  0xa8   :  { %v483_v63 = vadd.f32 1.0, %v69_v35  ;;  %v317_v36 = vpop.eup %316 }
  0xa9   :  { %v319_v40 = vpop.eup %318  ;;  %v561_v52 = vsel %vm128_vm2, 0.0, %v317_v36  ;;  %v587_v36 = vadd.s32 112, %v502_v28 }
  0xaa   :  { %v50_v37 = vpop.trf.xlu0  ;;  %324 = vrsqrt.f32 %v483_v63  ;;  %vm132_vm6 = vcmp.eq.f32.partialorder %v483_v63, 0.0 }
  0xab   :  { %v71_v39 = vpop.xlane.xlu1 %70  ;;  %v97_v48 = vadd.f32 %v96_v46, %v50_v37  ;;  %v512_v37 = vadd.s32 8, %v502_v28  ;;  %v531_v46 = vadd.s32 48, %v502_v28 }
  0xac   :  { %v486_v17 = vadd.f32 1.0, %v71_v39  ;;  %v321_v44 = vpop.eup %320 }
  0xae   :  { %v51_v41 = vpop.trf.xlu0  ;;  %326 = vrsqrt.f32 %v486_v17  ;;  %vm133_vm7 = vcmp.eq.f32.partialorder %v486_v17, 0.0 }
  0xaf   :  { %v73_v43 = vpop.xlane.xlu1 %72  ;;  %v98_v50 = vadd.f32 %v97_v48, %v51_v41 }
  0xb0   :  { %v489_v20 = vadd.f32 1.0, %v73_v43  ;;  %v524_v43 = vadd.s32 32, %v502_v28  ;;  %v323_v48 = vpop.eup %322 }
  0xb1   :  { %v571_v57 = vsel %vm131_vm5, 0.0, %v323_v48 }
  0xb2   :  { %v52_v45 = vpop.trf.xlu0  ;;  %328 = vrsqrt.f32 %v489_v20  ;;  %vm134_vm8 = vcmp.eq.f32.partialorder %v489_v20, 0.0 }
  0xb3   :  { %v75_v47 = vpop.xlane.xlu1 %74  ;;  %v99_v54 = vadd.f32 %v98_v50, %v52_v45  ;;  %v528_v45 = vadd.s32 40, %v502_v28  ;;  %v538_v50 = vadd.s32 64, %v502_v28 }
  0xb4   :  { %v492_v22 = vadd.f32 1.0, %v75_v47  ;;  %v534_v47 = vadd.s32 56, %v502_v28 }
  0xb6   :  { %v53_v49 = vpop.trf.xlu0  ;;  %330 = vrsqrt.f32 %v492_v22  ;;  %vm135_vm9 = vcmp.eq.f32.partialorder %v492_v22, 0.0 }
  0xb7   :  { %v77_v51 = vpop.xlane.xlu1 %76  ;;  %v100_v58 = vadd.f32 %v99_v54, %v53_v49  ;;  %v544_v54 = vadd.s32 80, %v502_v28 }
  0xb8   :  { %v495_v24 = vadd.f32 1.0, %v77_v51  ;;  %v541_v51 = vadd.s32 72, %v502_v28 }
  0xba   :  { %v54_v56 = vpop.trf.xlu0  ;;  %332 = vrsqrt.f32 %v495_v24  ;;  %vm136_vm10 = vcmp.eq.f32.partialorder %v495_v24, 0.0 }
  0xbb   :  { %v79_v59 = vpop.xlane.xlu1 %78  ;;  %v101_v62 = vadd.f32 %v100_v58, %v54_v56  ;;  %v325_v58 = vpop.eup %324 }
  0xbc   :  { %v498_v25 = vadd.f32 1.0, %v79_v59  ;;  %v549_v59 = vadd.s32 88, %v502_v28 }
  0xbe   :  { %v55_v16 = vpop.trf.xlu0  ;;  %334 = vrsqrt.f32 %v498_v25  ;;  %vm137_vm11 = vcmp.eq.f32.partialorder %v498_v25, 0.0 }
  0xbf   :  { %v102_v18 = vadd.f32 %v101_v62, %v55_v16  ;;  %v81_v19 = vpop.xlane.xlu1 %80  ;;  %v327_v16 = vpop.eup %326 }
  0xc0   :  { %v504_v29 = vadd.f32 1.0, %v81_v19 }
  0xc1   :  { %v103_v23 = vrot.slane %v102_v18, 4 }
  0xc2   :  { %336 = vrsqrt.f32 %v504_v29  ;;  %vm138_vm12 = vcmp.eq.f32.partialorder %v504_v29, 0.0 }
  0xc3   :  { %v104_v26 = vadd.f32 %v103_v23, %v102_v18  ;;  %v83_v27 = vpop.xlane.xlu1 %82  ;;  %v553_v18 = vsel %vm126_vm0, 0.0, %v313_v32  ;;  %v329_v23 = vpop.eup %328  ;;  %v574_v32 = vadd.s32 96, %v502_v28 }
  0xc4   :  { %v507_v31 = vadd.f32 1.0, %v83_v27  ;;  %v331_v53 = vpop.eup %330  ;;  %v565_v27 = vsel %vm129_vm3, 0.0, %v319_v40  ;;  %v590_v40 = vadd.s32 120, %v502_v28 }
  0xc5   :  { %v105_v30 = vrot.slane %v104_v26, 2  ;;  %v333_v55 = vpop.eup %332 }
  0xc6   :  { %338 = vrsqrt.f32 %v507_v31  ;;  %833 = vst [vmem:[#allocation2_spill] sm:$0xff] %v590_v40  ;;  %v607_v40 = vsel %vm134_vm8, 0.0, %v329_v23  ;;  %vm139_vm15 = vcmp.eq.f32.partialorder %v507_v31, 0.0 }
  0xc7   :  { %v106_v34 = vadd.f32 %v105_v30, %v104_v26  ;;  %v85_v35 = vpop.xlane.xlu1 %84  ;;  %v559_v26 = vsel %vm127_vm1, 0.0, %v315_v33  ;;  %v567_v30 = vsel %vm130_vm4, 0.0, %v321_v44  ;;  %v577_v33 = vand.u32 127, %v209_v21 }
  0xc8   :  { %v518_v39 = vadd.f32 1.0, %v85_v35  ;;  %v177_v35 = vmul.f32 %v553_v18, %v359_v0  ;;  %v178_v61 = vmul.f32 %v559_v26, %v366_v1  ;;  %v179_v21 = vmul.f32 %v561_v52, %v373_v2 }
  0xc9   :  { %v107_v41 = vrot.slane %v106_v34, 1  ;;  %v180_v44 = vmul.f32 %v565_v27, %v380_v3  ;;  %v181_v48 = vmul.f32 %v567_v30, %v387_v4  ;;  %v182_v1 = vmul.f32 %v571_v57, %v394_v5 }
  0xca   :  { %340 = vrsqrt.f32 %v518_v39  ;;  %v605_v2 = vsel %vm133_vm7, 0.0, %v327_v16  ;;  %v611_v3 = vsel %vm135_vm9, 0.0, %v331_v53  ;;  %v613_v4 = vsel %vm136_vm10, 0.0, %v333_v55 }
  0xcb   :  { %v108_v49 = vadd.f32 %v107_v41, %v106_v34  ;;  %v87_v56 = vpop.xlane.xlu1 %86  ;;  %v335_v34 = vpop.eup %334  ;;  %vm228_vm13 = vcmp.eq.s32.totalorder %v502_v28, %v577_v33  ;;  %vm229_vm14 = vcmp.eq.s32.totalorder %v512_v37, %v577_v33  ;;  %vm140_vm0 = vcmp.eq.f32.partialorder %v518_v39, 0.0 }
  0xcc   :  { %v551_v62 = vadd.f32 1.0, %v87_v56  ;;  %v337_v41 = vpop.eup %336  ;;  %v169_v5 = vsel %vm137_vm11, 0.0, %v335_v34  ;;  %v184_v20 = vmul.f32 %v605_v2, %v408_v7  ;;  %vm230_vm1 = vcmp.eq.s32.totalorder %v515_v38, %v577_v33 }
  0xcd   :  { %v557_v19 = vadd.f32 1.0, %v108_v49  ;;  %v601_v49 = vsel %vm132_vm6, 0.0, %v325_v58  ;;  %v170_v63 = vsel %vm138_vm12, 0.0, %v337_v41  ;;  %vm231_vm2 = vcmp.eq.s32.totalorder %v521_v42, %v577_v33 }
  0xce   :  { %342 = vrsqrt.f32 %v551_v62  ;;  %v183_v17 = vmul.f32 %v601_v49, %v401_v6  ;;  %vm232_vm3 = vcmp.eq.s32.totalorder %v524_v43, %v577_v33  ;;  %vm233_vm4 = vcmp.eq.s32.totalorder %v528_v45, %v577_v33 }
  0xcf   :  { %344 = vrsqrt.f32 %v557_v19  ;;  %v185_v7 = vmul.f32 %v607_v40, %v415_v8  ;;  %v186_v25 = vmul.f32 %v611_v3, %v422_v9  ;;  %v187_v29 = vmul.f32 %v613_v4, %v429_v10 }
  0xd0   :  { %v339_v0 = vpop.eup %338  ;;  %vm234_vm5 = vcmp.eq.s32.totalorder %v531_v46, %v577_v33  ;;  %vm235_vm6 = vcmp.eq.s32.totalorder %v534_v47, %v577_v33  ;;  %vm236_vm7 = vcmp.eq.s32.totalorder %v538_v50, %v577_v33  ;;  %vm237_vm8 = vcmp.eq.s32.totalorder %v541_v51, %v577_v33 }
  0xd1   :  { %v635_v22 = vsel %vm139_vm15, 0.0, %v339_v0  ;;  %vm141_vm9 = vcmp.eq.f32.partialorder %v551_v62, 0.0  ;;  %v188_v9 = vmul.f32 %v169_v5, %v436_v11  ;;  %vm174_vm10 = vcmp.eq.f32.partialorder %v557_v19, 0.0 }
  0xd2   :  { %vm238_vm11 = vcmp.eq.s32.totalorder %v544_v54, %v577_v33  ;;  %vm239_vm12 = vcmp.eq.s32.totalorder %v549_v59, %v577_v33  ;;  %vm240_vm15 = vcmp.eq.s32.totalorder %v574_v32, %v577_v33  ;;  %v189_v10 = vmul.f32 %v170_v63, %v443_v12 }
  0xd3   :  { %v669_v11 = vmul.f32 %v635_v22, %v450_v13 }
  0xd4   :  { %v341_v56 = vpop.eup %340 }
  0xd5   :  { %v637_v24 = vsel %vm140_vm0, 0.0, %v341_v56  ;;  %vm241_vm0 = vcmp.eq.s32.totalorder %v580_v60, %v577_v33 }
  0xd6   :  { %v673_v58 = vmul.f32 %v637_v24, %v457_v14 }
  0xd8   :  { %v343_v6 = vpop.eup %342 }
  0xd9   :  { %v345_v8 = vpop.eup %344  ;;  %v663_v31 = vsel %vm141_vm9, 0.0, %v343_v6  ;;  %vm242_vm9 = vcmp.eq.s32.totalorder %v587_v36, %v577_v33 }
  0xda   :  { %v665_v39 = vsel %vm174_vm10, 0.0, %v345_v8  ;;  %v677_v62 = vmul.f32 %v663_v31, %v464_v15 }
  0xdb   :  { %v193_v16 = vmul.f32 %v177_v35, %v665_v39  ;;  %v194_v12 = vmul.f32 %v178_v61, %v665_v39  ;;  %v195_v19 = vmul.f32 %v179_v21, %v665_v39  ;;  %v196_v23 = vmul.f32 %v180_v44, %v665_v39 }
  0xdc   :  { %v197_v53 = vmul.f32 %v181_v48, %v665_v39  ;;  %v198_v13 = vmul.f32 %v182_v1, %v665_v39  ;;  %v199_v55 = vmul.f32 %v183_v17, %v665_v39  ;;  %v200_v14 = vmul.f32 %v184_v20, %v665_v39 }
  0xdd   :  { %v201_v34 = vmul.f32 %v185_v7, %v665_v39  ;;  %v202_v15 = vmul.f32 %v186_v25, %v665_v39  ;;  %v203_v35 = vmul.f32 %v187_v29, %v665_v39  ;;  %v204_v61 = vmul.f32 %v188_v9, %v665_v39 }
  0xde   :  { %v205_v41 = vmul.f32 %v189_v10, %v665_v39  ;;  %v244_v21 = vmul.f32 %v665_v39, %v553_v18  ;;  %v245_v44 = vmul.f32 %v665_v39, %v559_v26  ;;  %v246_v48 = vmul.f32 %v665_v39, %v561_v52 }
  0xdf   :  { %v247_v0 = vmul.f32 %v665_v39, %v565_v27  ;;  %v248_v1 = vmul.f32 %v665_v39, %v567_v30  ;;  %v249_v56 = vmul.f32 %v665_v39, %v571_v57  ;;  %v250_v17 = vmul.f32 %v665_v39, %v601_v49  ;;  %v834_v30 = vld [vmem:[#allocation2_spill] sm:$0xff] }
  0xe0   :  { %v251_v18 = vmul.f32 %v665_v39, %v605_v2  ;;  %v252_v26 = vmul.f32 %v665_v39, %v607_v40  ;;  %v253_v52 = vmul.f32 %v665_v39, %v611_v3  ;;  %v254_v27 = vmul.f32 %v665_v39, %v613_v4 }
  0xe1   :  { %vm243_vm10 = vcmp.eq.s32.totalorder %v834_v30, %v577_v33  ;;  %v255_v57 = vmul.f32 %v665_v39, %v169_v5  ;;  %v256_v49 = vmul.f32 %v665_v39, %v170_v63  ;;  %v260_v2 = vsel %vm228_vm13, %v244_v21, 0.0 }
  0xe2   :  { %v261_v40 = vsel %vm229_vm14, %v245_v44, 0.0  ;;  %v262_v3 = vsel %vm230_vm1, %v246_v48, 0.0  ;;  %v263_v4 = vsel %vm231_vm2, %v247_v0, 0.0  ;;  %v264_v5 = vsel %vm232_vm3, %v248_v1, 0.0 }
  0xe3   :  { %v265_v28 = vsel %vm233_vm4, %v249_v56, 0.0  ;;  %v266_v37 = vsel %vm234_vm5, %v250_v17, 0.0  ;;  %v267_v38 = vsel %vm235_vm6, %v251_v18, 0.0  ;;  %v268_v42 = vsel %vm236_vm7, %v252_v26, 0.0 }
  0xe4   :  { %v269_v43 = vsel %vm237_vm8, %v253_v52, 0.0  ;;  %v270_v45 = vsel %vm238_vm11, %v254_v27, 0.0  ;;  %v271_v46 = vsel %vm239_vm12, %v255_v57, 0.0  ;;  %v272_v47 = vsel %vm240_vm15, %v256_v49, 0.0 }
  0xe5   :  { %v276_v63 = vadd.f32 %v260_v2, %v193_v16  ;;  %v277_v20 = vadd.f32 %v261_v40, %v194_v12  ;;  %v278_v50 = vadd.f32 %v262_v3, %v195_v19  ;;  %v279_v6 = vadd.f32 %v263_v4, %v196_v23 }
  0xe6   :  { %v280_v7 = vadd.f32 %v264_v5, %v197_v53  ;;  %v281_v25 = vadd.f32 %v265_v28, %v198_v13  ;;  %v282_v51 = vadd.f32 %v266_v37, %v199_v55  ;;  %v283_v29 = vadd.f32 %v267_v38, %v200_v14 }
  0xe7   :  { %v284_v8 = vadd.f32 %v268_v42, %v201_v34  ;;  %292 = vst [vmem:[%s831_s1] sm:$0xff] %v276_v63  ;;  %v285_v54 = vadd.f32 %v269_v43, %v202_v15  ;;  %v286_v59 = vadd.f32 %v270_v45, %v203_v35  ;;  %v287_v9 = vadd.f32 %v271_v46, %v204_v61 }
  0xe8   :  { %v288_v10 = vadd.f32 %v272_v47, %v205_v41  ;;  %293 = vst [vmem:[%s831_s1 + $0x8] sm:$0xff] %v277_v20  ;;  %294 = vst [vmem:[%s831_s1 + $0x10] sm:$0xff] %v278_v50  ;;  %v206_v32 = vmul.f32 %v669_v11, %v665_v39  ;;  %v257_v16 = vmul.f32 %v665_v39, %v635_v22 }
  0xe9   :  { %295 = vst [vmem:[%s831_s1 + $0x18] sm:$0xff] %v279_v6  ;;  %296 = vst [vmem:[%s831_s1 + $0x20] sm:$0xff] %v280_v7  ;;  %v207_v12 = vmul.f32 %v673_v58, %v665_v39  ;;  %v258_v19 = vmul.f32 %v665_v39, %v637_v24  ;;  %v208_v22 = vmul.f32 %v677_v62, %v665_v39 }
  0xea   :  { %297 = vst [vmem:[%s831_s1 + $0x28] sm:$0xff] %v281_v25  ;;  %298 = vst [vmem:[%s831_s1 + $0x30] sm:$0xff] %v282_v51  ;;  %v259_v24 = vmul.f32 %v665_v39, %v663_v31  ;;  %v273_v11 = vsel %vm241_vm0, %v257_v16, 0.0 }
  0xeb   :  { %299 = vst [vmem:[%s831_s1 + $0x38] sm:$0xff] %v283_v29  ;;  %300 = vst [vmem:[%s831_s1 + $0x40] sm:$0xff] %v284_v8  ;;  %v274_v58 = vsel %vm242_vm9, %v258_v19, 0.0  ;;  %v289_v23 = vadd.f32 %v273_v11, %v206_v32 }
  0xec   :  { %301 = vst [vmem:[%s831_s1 + $0x48] sm:$0xff] %v285_v54  ;;  %302 = vst [vmem:[%s831_s1 + $0x50] sm:$0xff] %v286_v59  ;;  %v290_v53 = vadd.f32 %v274_v58, %v207_v12  ;;  %v275_v13 = vsel %vm243_vm10, %v259_v24, 0.0 }
  0xed   :  { %303 = vst [vmem:[%s831_s1 + $0x58] sm:$0xff] %v287_v9  ;;  %304 = vst [vmem:[%s831_s1 + $0x60] sm:$0xff] %v288_v10  ;;  %v291_v55 = vadd.f32 %v275_v13, %v208_v22 }
  0xee   :  { %305 = vst [vmem:[%s831_s1 + $0x68] sm:$0xff] %v289_v23  ;;  %306 = vst [vmem:[%s831_s1 + $0x70] sm:$0xff] %v290_v53 }
  0xef   :  { %307 = vst [vmem:[%s831_s1 + $0x78] sm:$0xff] %v291_v55 }

</bundles_post_ra>
